<compile_context>
chip_gen: v6e
topology: v6e:2x2x1
jax: 0.10.0
libtpu: 0.0.40
codegen_flags: <defaults>
</compile_context>

<pallas_src>
import jax
import jax.numpy as jnp
from jax.experimental import pallas as pl
from jax.experimental.pallas import tpu as pltpu

_TARGET_BLOCK_BYTES = 2 * 1024 * 1024   # ~2 MiB per-array tile (all gens safe)
_MIN_GRID_STEPS = 8                     # hide DMA prologue, feed 2 TCs on v7x


def _pick_row_tile(R, B, row_bytes, itemsize):
    """Row tile Rt that divides R (sublane aligned), keeps each data tile
    <= _TARGET_BLOCK_BYTES, and prefers a grid of >= _MIN_GRID_STEPS steps."""
    sub = 8 * max(1, 4 // itemsize)     # sublane pack: 8 f32 / 16 bf16 / 32 i8
    cands = [rt for rt in range(sub, R, sub) if R % rt == 0] + [R]
    fitting = [rt for rt in cands if rt * row_bytes <= _TARGET_BLOCK_BYTES]
    if not fitting:
        fitting = [min(cands)]
    good = [rt for rt in fitting if B * (R // rt) >= _MIN_GRID_STEPS]
    return max(good) if good else max(fitting)


# --------------------------------------------------------------------------
# Kernel: out = y + x * mask, mask broadcast along shared block dims.
# --------------------------------------------------------------------------
def _make_mul_add_kernel(c_tile):
    def kernel(x_ref, y_ref, m_ref, o_ref):
        m = m_ref[...]
        if c_tile > 1:
            # Mask is shared along C: the (.., D) mask tiles c_tile times
            # along the collapsed C*D lane axis (lane concat; rides for free
            # on this HBM-bound kernel).
            m = jnp.tile(m, (1, 1, c_tile))
        # Mask is pre-scaled and in x's dtype: one mul + one add per vreg.
        # Size-1 mask block dims (shared B / R) broadcast automatically.
        o_ref[...] = y_ref[...] + x_ref[...] * m
    return kernel


def _fused_mul_add(x, y, mask, share_dim, inplace=False):
    """x, y: (B, R, C, D); mask: same rank, size-1 along shared dims,
    same dtype as x, already scaled by 1/(1-p)."""
    B, R, C, D = x.shape
    itemsize = jnp.dtype(x.dtype).itemsize
    b_shared = 0 in share_dim
    r_shared = 1 in share_dim
    c_shared = 2 in share_dim
    d_shared = 3 in share_dim

    # Lane-dense data layout: collapse (C, D) -> C*D for unmasked 128-lane
    # stores regardless of D.
    L = C * D
    x3 = x.reshape(B, R, L)
    y3 = y.reshape(B, R, L)

    if c_shared and not d_shared and D % 128 == 0:
        # Columnwise sharing with lane-aligned channels (typical deepfold
        # case): stream only the (.., D) mask and tile it inside the kernel.
        c_tile = C
        m3 = mask.reshape(mask.shape[0], mask.shape[1], D)
    else:
        # Expand shared C/D dims in the wrapper (cheap unless nothing else is
        # shared); sharing along B / R is still handled by block broadcasting.
        c_tile = 1
        m3 = jnp.broadcast_to(
            mask, mask.shape[:2] + (C, D)).reshape(mask.shape[0],
                                                   mask.shape[1], L)
    Lm = m3.shape[-1]

    row_bytes = itemsize * L
    Rt = _pick_row_tile(R, B, row_bytes, itemsize)
    nR = R // Rt
    Rmt = 1 if r_shared else Rt

    data_block = (1, Rt, L)
    mask_block = (1, Rmt, Lm)

    def data_idx(b, r):
        return (b, r, 0)

    def mask_idx(b, r):
        return (0 if b_shared else b, 0 if r_shared else r, 0)

    # Right-size the scoped VMEM request from actual double-buffered usage.
    blk_bytes = itemsize * Rt * L
    mblk_bytes = itemsize * Rmt * Lm
    vmem_limit = min(64 * 1024 * 1024,
                     max(2 * (3 * blk_bytes + mblk_bytes) + (2 << 20),
                         16 << 20))

    out = pl.pallas_call(
        _make_mul_add_kernel(c_tile),
        out_shape=jax.ShapeDtypeStruct(x3.shape, x3.dtype),
        grid=(B, nR),
        in_specs=[pl.BlockSpec(data_block, data_idx),   # x
                  pl.BlockSpec(data_block, data_idx),   # add_output_to
                  pl.BlockSpec(mask_block, mask_idx)],  # mask (reduced shape)
        out_specs=pl.BlockSpec(data_block, data_idx),
        input_output_aliases=({1: 0} if inplace else {}),
        compiler_params=pltpu.CompilerParams(
            dimension_semantics=("parallel", "parallel"),
            vmem_limit_bytes=vmem_limit),
    )(x3, y3, m3)
    return out.reshape(x.shape)


# --------------------------------------------------------------------------
# Mask construction (JAX equivalent of F.dropout(x.new_ones(mask_shape), p)).
# --------------------------------------------------------------------------
def _dropout_mask(key, p, shape, share_dim, dtype):
    """Pre-scaled dropout mask with values in {0, 1/(1-p)}, size-1 along the
    shared dims."""
    mask_shape = tuple(1 if d in share_dim else s for d, s in enumerate(shape))
    keep = jax.random.bernoulli(key, 1.0 - p, mask_shape)
    scale = 1.0 / (1.0 - p)
    return jnp.where(keep, jnp.asarray(scale, dtype), jnp.asarray(0.0, dtype))


# --------------------------------------------------------------------------
# Module-level wrapper (Dropout.forward equivalent).
# --------------------------------------------------------------------------
def dropout_mul_add(x, add_output_to, *, p, share_dim=(), key=None,
                    training=True, inplace=False):
    """JAX/Pallas equivalent of deepfold Dropout.forward(x, add_output_to)."""
    assert 0.0 <= p <= 1.0
    assert add_output_to.shape == x.shape and add_output_to.dtype == x.dtype
    if isinstance(share_dim, int):
        share_dim = (share_dim,)
    share_dim = tuple(d % x.ndim for d in share_dim)

    if (not training) or p == 0.0:
        # Identity mask: a bare add lets XLA fuse into neighbouring ops
        # (a pallas_call here would just be a fusion barrier).
        return add_output_to + x

    if p >= 1.0:
        # Everything is dropped -> out == add_output_to exactly (no NaN even
        # if x contains inf/NaN, unlike y + x*0).
        return add_output_to

    assert key is not None, "a PRNG key is required in training mode"
    nd = x.ndim
    assert 2 <= nd <= 4, "kernel supports 2-D..4-D inputs"
    # TODO(synk): support >4-D inputs by collapsing compatible leading dims.

    mask = _dropout_mask(key, p, x.shape, share_dim, x.dtype)

    # Canonicalize to (B, R, C, D) by padding leading size-1 dims.
    pad = 4 - nd
    x4 = x.reshape((1,) * pad + x.shape)
    y4 = add_output_to.reshape((1,) * pad + add_output_to.shape)
    m4 = mask.reshape((1,) * pad + mask.shape)
    share4 = tuple(d + pad for d in share_dim)

    # TODO(synk): dap_scattered_dim / mp.scatter (model-parallel mask scatter)
    # has no single-device Pallas equivalent.
    out = _fused_mul_add(x4, y4, m4, share4, inplace=inplace)
    return out.reshape(x.shape)


if __name__ == "__main__":
    root = jax.random.PRNGKey(0)
    kx, ky, k1, k2, k3, k4 = jax.random.split(root, 6)

    p = 0.25

    # ---- rowwise-shared dropout on a (B, R, C, D) tensor -----------------
    B, R, C, D = 2, 64, 16, 32
    x = jax.random.normal(kx, (B, R, C, D), dtype=jnp.float32)
    y = jax.random.normal(ky, (B, R, C, D), dtype=jnp.float32)

    out = jax.block_until_ready(
        dropout_mul_add(x, y, p=p, share_dim=(1,), key=k1, training=True))
    ref = y + x * _dropout_mask(k1, p, x.shape, (1,), x.dtype)
    assert out.shape == x.shape and out.dtype == x.dtype
    assert jnp.allclose(out, ref, atol=1e-6, rtol=1e-6)

    # ---- no sharing: every element keeps/drops independently -------------
    out_ns = jax.block_until_ready(
        dropout_mul_add(x, y, p=p, share_dim=(), key=k2, training=True))
    ref_ns = y + x * _dropout_mask(k2, p, x.shape, (), x.dtype)
    assert jnp.allclose(out_ns, ref_ns, atol=1e-6, rtol=1e-6)

    # inplace variant (aliases add_output_to -> out)
    out_ip = jax.block_until_ready(
        dropout_mul_add(x, y, p=p, share_dim=(), key=k2, training=True,
                        inplace=True))
    assert jnp.allclose(out_ip, ref_ns, atol=1e-6, rtol=1e-6)

    # ---- columnwise sharing with lane-aligned channels (in-kernel tile) ---
    B2, R2, C2, D2 = 2, 16, 8, 128
    x2 = jax.random.normal(kx, (B2, R2, C2, D2), dtype=jnp.float32)
    y2 = jax.random.normal(ky, (B2, R2, C2, D2), dtype=jnp.float32)
    out2 = jax.block_until_ready(
        dropout_mul_add(x2, y2, p=p, share_dim=(2,), key=k3, training=True))
    ref2 = y2 + x2 * _dropout_mask(k3, p, x2.shape, (2,), x2.dtype)
    assert jnp.allclose(out2, ref2, atol=1e-6, rtol=1e-6)

    # ---- bf16 + 3-D input (leading-dim padding path) ----------------------
    x3 = jax.random.normal(kx, (8, 16, 32), dtype=jnp.bfloat16)
    y3 = jax.random.normal(ky, (8, 16, 32), dtype=jnp.bfloat16)
    out3 = jax.block_until_ready(
        dropout_mul_add(x3, y3, p=p, share_dim=(0,), key=k4, training=True))
    ref3 = y3 + x3 * _dropout_mask(k4, p, x3.shape, (0,), x3.dtype)
    assert out3.dtype == jnp.bfloat16
    assert jnp.allclose(out3.astype(jnp.float32), ref3.astype(jnp.float32),
                        atol=1e-2, rtol=1e-2)

    # ---- p == 1 drops everything; eval mode is identity + add -------------
    out_p1 = jax.block_until_ready(
        dropout_mul_add(x, y, p=1.0, share_dim=(1,), key=k1, training=True))
    assert jnp.allclose(out_p1, y)
    out_ev = jax.block_until_ready(
        dropout_mul_add(x, y, p=p, share_dim=(1,), key=k1, training=False))
    assert jnp.allclose(out_ev, y + x, atol=1e-6, rtol=1e-6)

    print("KERNEL_OK")
</pallas_src>

<mosaic_0001>
module attributes {stable_mosaic.version = 11 : i64} {
  func.func @kernel(%arg0: i32, %arg1: i32, %arg2: memref<1x16x512xf32, #tpu.memory_space<vmem>>, %arg3: memref<1x16x512xf32, #tpu.memory_space<vmem>>, %arg4: memref<1x1x512xf32, #tpu.memory_space<vmem>>, %arg5: memref<1x16x512xf32, #tpu.memory_space<vmem>>) attributes {dimension_semantics = [#tpu.dimension_semantics<parallel>, #tpu.dimension_semantics<parallel>], iteration_bounds = array<i64: 2, 4>, scalar_prefetch = 0 : i64, scratch_operands = 0 : i64, tpu.core_type = #tpu.core_type<tc>, window_params = [{transform_indices = @transform_0, window_bounds = array<i64: 1, 16, 512>}, {transform_indices = @transform_1, window_bounds = array<i64: 1, 16, 512>}, {transform_indices = @transform_2, window_bounds = array<i64: 1, 1, 512>}, {transform_indices = @transform_3, window_bounds = array<i64: 1, 16, 512>}]} {
    %c0 = arith.constant 0 : index
    %c0_0 = arith.constant 0 : index
    %c0_1 = arith.constant 0 : index
    %0 = vector.load %arg4[%c0, %c0_0, %c0_1] : memref<1x1x512xf32, #tpu.memory_space<vmem>>, vector<1x1x512xf32>
    %c0_2 = arith.constant 0 : index
    %c0_3 = arith.constant 0 : index
    %c0_4 = arith.constant 0 : index
    %1 = vector.load %arg3[%c0_2, %c0_3, %c0_4] : memref<1x16x512xf32, #tpu.memory_space<vmem>>, vector<1x16x512xf32>
    %c0_5 = arith.constant 0 : index
    %c0_6 = arith.constant 0 : index
    %c0_7 = arith.constant 0 : index
    %2 = vector.load %arg2[%c0_5, %c0_6, %c0_7] : memref<1x16x512xf32, #tpu.memory_space<vmem>>, vector<1x16x512xf32>
    %3 = vector.broadcast %0 : vector<1x1x512xf32> to vector<1x16x512xf32>
    %4 = arith.mulf %2, %3 : vector<1x16x512xf32>
    %5 = arith.addf %1, %4 : vector<1x16x512xf32>
    %c0_8 = arith.constant 0 : index
    %c0_9 = arith.constant 0 : index
    %c0_10 = arith.constant 0 : index
    %6 = vector.load %arg5[%c0_8, %c0_9, %c0_10] : memref<1x16x512xf32, #tpu.memory_space<vmem>>, vector<1x16x512xf32>
    tpu.vector_store %arg5[%c0_8, %c0_9, %c0_10], %5 {strides = array<i32>} : memref<1x16x512xf32, #tpu.memory_space<vmem>>, vector<1x16x512xf32>,
    return
  }
  func.func @transform_0(%arg0: i32, %arg1: i32) -> (i32, i32, i32) {
    %c0_i32 = arith.constant 0 : i32
    %c0_i32_0 = arith.constant 0 : i32
    return %arg0, %arg1, %c0_i32 : i32, i32, i32
  }
  func.func @transform_1(%arg0: i32, %arg1: i32) -> (i32, i32, i32) {
    %c0_i32 = arith.constant 0 : i32
    %c0_i32_0 = arith.constant 0 : i32
    return %arg0, %arg1, %c0_i32 : i32, i32, i32
  }
  func.func @transform_2(%arg0: i32, %arg1: i32) -> (i32, i32, i32) {
    %c0_i32 = arith.constant 0 : i32
    %c0_i32_0 = arith.constant 0 : i32
    %c0_i32_1 = arith.constant 0 : i32
    return %arg0, %c0_i32, %c0_i32_0 : i32, i32, i32
  }
  func.func @transform_3(%arg0: i32, %arg1: i32) -> (i32, i32, i32) {
    %c0_i32 = arith.constant 0 : i32
    %c0_i32_0 = arith.constant 0 : i32
    return %arg0, %arg1, %c0_i32 : i32, i32, i32
  }
}

</mosaic_0001>

<bundles_post_ra>
// kernel: tpu_custom_call.1
= control target key start
LH: loop header
LB: loop body
LE: loop exit
PB: predicated region body
PF: predicated region fallthrough
CT: control target
= control target key end

     0   :  { %s1215_s0 = inlined_call_operand.hbm [shape: f32[2,64,512], index: 0, kind: input, shape index: {}]   ;;  %s1216_s1 = inlined_call_operand.hbm [shape: f32[2,64,512], index: 1, kind: input, shape index: {}]   ;;  %s1217_s2 = inlined_call_operand.hbm [shape: f32[2,1,512], index: 2, kind: input, shape index: {}]   ;;  %s1218_s3 = inlined_call_operand.hbm [shape: f32[2,64,512], index: 3, kind: output, shape index: {}]  }
   0x1   :  { %1231 = sst [smem:[#allocation21_spill]] %s1216_s1 }
   0x2   :  { %1232 = sst [smem:[#allocation22_spill]] %s1218_s3 }
   0x3   :  { %8 = vsyncpa [#allocation3], 0 }
   0x4   :  { %10 = vsyncpa [#allocation3 + $0x1], 0 }
   0x5   :  { %11 = vsyncpa [#allocation6], 0 }
   0x6   :  { %13 = vsyncpa [#allocation6 + $0x1], 0 }
   0x7   :  { %14 = vsyncpa [#allocation4], 0 }
   0x8   :  { %16 = vsyncpa [#allocation4 + $0x1], 0  ;;  %s897_s12 = smov 0   ;;  %s899_s13 = smov 0  }
   0x9   :  { %s901_s14 = smov 0   ;;  %s903_s15 = smov 0  }
   0xa   :  { %s905_s16 = smov 0   ;;  %s907_s17 = smov 0  }
   0xb   :  { %s909_s18 = smov 0   ;;  %s911_s19 = smov 0  }
   0xc   :  { %s913_s20 = smov 0   ;;  %s915_s21 = smov 0  }
   0xd   :  { %s917_s22 = smov 0  }
   0xe LB: > { %1233 = sst [smem:[#allocation13_spill]] %s851_s18  ;;  %s953_s23 = sadd.s32 4294967295, %s867_s22   ;;  %s867_s22 = sphi %s917_s22, %s22_s22   ;;  %s863_s21 = sphi %s915_s21, %s1273_s21   ;;  %s859_s20 = sphi %s913_s20, %s1263_s20   ;;  %s855_s19 = sphi %s911_s19, %s1272_s19   ;;  %s851_s18 = sphi %s909_s18, %s1271_s18   ;;  %s847_s17 = sphi %s907_s17, %s1270_s17   ;;  %s843_s16 = sphi %s905_s16, %s1269_s16   ;;  %s839_s15 = sphi %s903_s15, %s1268_s15   ;;  %s835_s14 = sphi %s901_s14, %s1267_s14   ;;  %s831_s13 = sphi %s899_s13, %s1266_s13   ;;  %s827_s12 = sphi %s897_s12, %s1265_s12  }
   0xf   : > { %1234 = sst [smem:[#allocation14_spill]] %s855_s19  ;;  %s507_s24 = sadd.s32 4294967294, %s867_s22  }
  0x10   : > { %1235 = sst [smem:[#allocation15_spill]] %s859_s20  ;;  %s31_s25 = sadd.s32 1, %s859_s20 }
  0x11   : > { %s34_s26 = sadd.s32 1, %s863_s21  ;;  %p32_p0 = scmp.ge.s32.totalorder %s31_s25, 4 }
  0x12   : > { %s43_s27 = sadd.s32 1, %s847_s17  ;;  %p50_p1 = scmp.ne.s32.totalorder %s847_s17, %s843_s16 }
  0x13   : > { %p1225_p2 = scmp.eq.s32.totalorder %s867_s22, 0  ;;  %s1275_s25 = smov (%p32_p0, %s31_s25), 0 }
  0x14   : > { %1236 = sst [smem:[#allocation16_spill]] %s1275_s25  ;;  %s1277_s26 = smov (!%p32_p0, %s34_s26), %s863_s21 }
  0x15   : > { %s39_s28 = ssub.s32 %s859_s20, %s1275_s25  ;;  %p969_p3 = por %p1225_p2, %p50_p1 }
  0x16   : > { %p36_p4 = scmp.ge.s32.totalorder %s1277_s26, 2  ;;  %p1226_p5 = scmp.ne.s32.totalorder %s843_s16, %s839_s15 }
  0x17   : > { %p136_p6 = scmp.eq.s32.totalorder %s953_s23, 7  ;;  %p142_p7 = scmp.eq.s32.totalorder %s507_s24, 7 }
  0x18   : > { %s1279_s26 = smov (%p36_p4, %s1277_s26), 0  ;;  %p1224_p12 = scmp.lt.s32.totalorder %s867_s22, 8 }
  0x19   : > { %1238 = sst [smem:[#allocation17_spill]] %s1279_s26  ;;  %p978_p8 = por %p136_p6, %p50_p1 }
  0x1a   : > { %p985_p9 = por %p142_p7, %p1226_p5  ;;  %s991_s5 = ssub.s32 %s863_s21, %s1279_s26 }
  0x1b   : > { %s1239_s30 = scalar_select %p978_p8, 1, 0 }
  0x1c   : > { %s1241_s4 = scalar_select %p985_p9, 1, 0 }
  0x1d   : > { %1240 = sst [smem:[#allocation18_spill]] %s1239_s30  ;;  %s40_s6 = sor.u32 %s39_s28, %s991_s5 }
  0x1e   : > { %1242 = sst [smem:[#allocation19_spill]] %s1241_s4  ;;  %p95_p10 = scmp.eq.s32.totalorder %s991_s5, 0 }
  0x1f   : > { %p41_p11 = scmp.eq.s32.totalorder %s40_s6, 0  ;;  %s1220_s7 = sand.u32 1, %s847_s17  }
  0x20   : > { %s535_s8 = sshll.u32 %s859_s20, 3  ;;  %s1003_s10 = sshll.u32 %s1220_s7, 6 }
  0x21   : > { %s999_s9 = scalar_select %p41_p11, %s847_s17, %s43_s27  }
  0x22   : > { %s513_s11 = sshll.u32 %s863_s21, 5  ;;  %p1012_p13 = pnand %p1224_p12, %p969_p3 }
  0x23   : > { %1243 = sst [smem:[#allocation20_spill]] %s999_s9  ;;  %s1006_s24 = sadd.s32 %s535_s8, %s513_s11 }
  0x24   : > { %s514_s6 = sshll.u32 %s1006_s24, 7  ;;  %s186_s27 = sand.u32 1, %s867_s22  }
  0x25   : > { %s1245_s1 = sld [smem:[#allocation21_spill]]  ;;  %s190_s20 = scalar_lea.vmem [#allocation5], %s1003_s10 }
  0x26   : > { %s200_s8 = sshll.u32 %s190_s20, 4  ;;  %p523_p0 = scmp.ge.s32.totalorder %s867_s22, 1  ;;  %s201_s8 = int_to_ptr.vmem [resolvable:$true] %s200_s8 }
  0x27   : > { %p227_p1 = scmp.lt.s32.totalorder %s867_s22, 9  ;;  %s1026_s29 = scalar_lea.sflag [#allocation6], %s186_s27 }
  0x28   : > { %p657_p3 = pneg %p1012_p13  ;;  %s668_s11 = scalar_lea.vmem %s201_s8, 1024 }
  0x29   : > { %p669_p4 = scmp.ne.s32.totalorder %s201_s8, %s668_s11  ;;  %s869_s9 = smov [#allocation5]  }
  0x2a   : > { %s673_s4 = sshll.u32 %s869_s9, 4  ;;  %s674_s4 = int_to_ptr.vmem [resolvable:$false] %s673_s4 }
  0x2b   : > { %s199_s25 = scalar_lea.hbm %s1245_s1, %s514_s6  ;;  %p671_p6 = pnand %p669_p4, %p657_p3 }
  0x2c   : > { %s675_s26 = scalar_lea.vmem %s674_s4, 2048  ;;  %p676_p11 = scmp.lt.s32.totalorder %s201_s8, %s674_s4 }
  0x2d   : > { %p672_p7 = pneg %p671_p6  ;;  %p677_p12 = scmp.lt.s32.totalorder %s675_s26, %s668_s11 }
  0x2f   : > { %p678_p2 = por %p677_p12, %p676_p11 }
  0x31   : > { %p679_p5 = pnand %p678_p2, %p672_p7 }
  0x33   : > { %682 = shalt.err (!%p679_p5)
}
  0x34   : > { %s870_s20 = smov 512   ;;  %s871_s7 = smov 32  }
  0x35   : > { %553 = dma.hbm_to_vmem [thread:$0]  (!%p1012_p13), %s199_s25, 1024, %s201_s8, %s1026_s29, %s870_s20, %s870_s20, %s871_s7  }
  0x36   : > { %p1040_p4 = pnand %p523_p0, %p227_p1  ;;  %s175_s11 = scalar_lea.hbm %s1215_s0, %s514_s6 }
  0x37   : > { %s166_s26 = scalar_lea.vmem [#allocation2], %s1003_s10  ;;  %s1247_s3 = sand.u32 1, %s847_s17  }
  0x38   : > { %s176_s1 = sshll.u32 %s166_s26, 4  ;;  %s163_s30 = scalar_lea.sflag [#allocation3], %s1247_s3  ;;  %s177_s1 = int_to_ptr.vmem [resolvable:$true] %s176_s1 }
  0x39   : > { %s696_s19 = scalar_lea.vmem %s177_s1, 1024  ;;  %s872_s25 = smov [#allocation2]  }
  0x3a   : > { %p697_p2 = scmp.ne.s32.totalorder %s177_s1, %s696_s19  ;;  %s701_s8 = sshll.u32 %s872_s25, 4  ;;  %s702_s8 = int_to_ptr.vmem [resolvable:$false] %s701_s8 }
  0x3b   : > { %s703_s18 = scalar_lea.vmem %s702_s8, 2048  ;;  %p704_p0 = scmp.lt.s32.totalorder %s177_s1, %s702_s8 }
  0x3c   : > { %p699_p5 = pnand %p697_p2, %p657_p3  ;;  %p705_p1 = scmp.lt.s32.totalorder %s703_s18, %s696_s19 }
  0x3e   : > { %p700_p12 = pneg %p699_p5  ;;  %p706_p6 = por %p705_p1, %p704_p0 }
  0x40   : > { %p707_p7 = pnand %p706_p6, %p700_p12 }
  0x42   : > { %710 = shalt.err (!%p707_p7)
}
  0x43   : > { %550 = dma.hbm_to_vmem [thread:$0]  (!%p1012_p13), %s175_s11, 1024, %s177_s1, %s163_s30, %s870_s20, %s870_s20, %s871_s7  }
  0x44   : > { %p57_p3 = scmp.eq.s32.totalorder %s953_s23, 0  ;;  %s97_s3 = sadd.s32 1, %s835_s14 }
  0x45   : > { %s1062_s18 = scalar_select %p95_p10, %s835_s14, %s97_s3  }
  0x46   : > { %p1248_p11 = scmp.ne.s32.totalorder %s843_s16, %s839_s15  ;;  %p104_p5 = scmp.ne.s32.totalorder %s835_s14, %s831_s13 }
  0x47   : > { %p110_p12 = scmp.ne.s32.totalorder %s831_s13, %s827_s12  ;;  %s212_s10 = sand.u32 1, %s835_s14  }
  0x48   : > { %p1067_p2 = por %p57_p3, %p1248_p11  ;;  %p1250_p0 = scmp.eq.s32.totalorder %s867_s22, 0 }
  0x49   : > { %s520_s24 = sshll.u32 %s212_s10, 2  ;;  %p1078_p6 = por %p110_p12, %p57_p3 }
  0x4a   : > { %p106_p1 = por %p104_p5, %p1250_p0  ;;  %s537_s1 = sshll.u32 %s863_s21, 6 }
  0x4b   : > { %s214_s30 = scalar_lea.vmem [#allocation7], %s520_s24  ;;  %s220_s7 = scalar_lea.hbm %s1217_s2, %s537_s1 }
  0x4c   : > { %s222_s5 = sshll.u32 %s214_s30, 4  ;;  %p1252_p10 = scmp.lt.s32.totalorder %s867_s22, 8  ;;  %s223_s5 = int_to_ptr.vmem [resolvable:$true] %s222_s5 }
  0x4d   : > { %s724_s12 = scalar_lea.vmem %s223_s5, 64  ;;  %s873_s27 = smov [#allocation7]  }
  0x4e   : > { %p1088_p13 = pnand %p1252_p10, %p106_p1  ;;  %p725_p3 = scmp.ne.s32.totalorder %s223_s5, %s724_s12 }
  0x4f   : > { %s729_s11 = sshll.u32 %s873_s27, 4  ;;  %s730_s11 = int_to_ptr.vmem [resolvable:$false] %s729_s11 }
  0x50   : > { %p713_p7 = pneg %p1088_p13  ;;  %s731_s26 = scalar_lea.vmem %s730_s11, 128 }
  0x51   : > { %p732_p12 = scmp.lt.s32.totalorder %s223_s5, %s730_s11  ;;  %p733_p0 = scmp.lt.s32.totalorder %s731_s26, %s724_s12 }
  0x52   : > { %p727_p11 = pnand %p725_p3, %p713_p7 }
  0x53   : > { %p734_p9 = por %p733_p0, %p732_p12 }
  0x54   : > { %p728_p5 = pneg %p727_p11 }
  0x56   : > { %p735_p8 = pnand %p734_p9, %p728_p5 }
  0x58   : > { %738 = shalt.err (!%p735_p8)
}
  0x59   : > { %556 = dma.hbm_to_vmem [thread:$0]  (!%p1088_p13), %s220_s7, 64, %s223_s5, %s1026_s29  }
  0x5a   : > { %231 = sbr.rel (%p1040_p4) target bundleno = 133 (0x85), region = 32  ;;  %s1100_s25 = sand.u32 (!%p1040_p4), 1, %s843_s16  }
  0x5b   : > { %s1103_s8 = sshll.u32 (!%p1040_p4), %s1100_s25, 6  ;;  %s234_s3 = scalar_lea.sflag (!%p1040_p4), [#allocation3], %s1100_s25 }
  0x5c   : > { %s1107_s10 = scalar_lea.vmem (!%p1040_p4), [#allocation2], %s1103_s8 }
  0x5f   : > { %810 = dma.done.wait (%p1067_p2), %s234_s3, 1024  }
  0x60   : > { %812 = vsyncadd (%p1067_p2), %s234_s3, 4294966272  ;;  %s242_s29 = sand.u32 1, %s953_s23   ;;  %s1115_s24 = scalar_lea.vmem [#allocation5], %s1103_s8 }
  0x61   : > { %s243_s4 = scalar_lea.sflag [#allocation6], %s242_s29 }
  0x62   : > { %814 = dma.done.wait (%p1067_p2), %s243_s4, 1024  }
  0x63   : > { %816 = vsyncadd (%p1067_p2), %s243_s4, 4294966272  ;;  %s253_s1 = sand.u32 1, %s831_s13  }
  0x64   : > { %s526_s30 = sshll.u32 %s253_s1, 2 }
  0x65   : > { %s255_s5 = scalar_lea.vmem [#allocation7], %s526_s30 }
  0x66   : > { %818 = dma.done.wait (%p1078_p6), %s243_s4, 64  }
  0x67   : > { %820 = vsyncadd (%p1078_p6), %s243_s4, 4294967232  ;;  %s1254_s6 = sld [smem:[#allocation13_spill]]  ;;  %v309_v0 = vlaneseq  ;;  %v291_v6 = vld [vmem:[%s255_s5] sm:$0xf]  ;;  %v293_v10 = vld [vmem:[%s1115_s24 + $0x8] sm:$0xff]  ;;  %s287_s7 = scalar_lea.vmem [#allocation8], %s1103_s8 }
  0x68   : > { %s1255_s23 = sld [smem:[#allocation14_spill]]  ;;  %v292_v7 = vld [vmem:[%s1115_s24] sm:$0xff]  ;;  %v301_v11 = vld [vmem:[%s1107_s10 + $0x8] sm:$0xff]  ;;  %v294_v13 = vld [vmem:[%s1115_s24 + $0x10] sm:$0xff]  ;;  %s370_s9 = sshll.u32 %s287_s7, 4  ;;  %s1148_s9 = int_to_ptr.vmem [resolvable:$true] %s370_s9 }
  0x69   : > { %v310_v1 = vshrl.u32 %v309_v0, 7  ;;  %v300_v8 = vld [vmem:[%s1107_s10] sm:$0xff]  ;;  %v302_v16 = vld [vmem:[%s1107_s10 + $0x10] sm:$0xff]  ;;  %v295_v17 = vld [vmem:[%s1115_s24 + $0x18] sm:$0xff]  ;;  %s1256_s27 = sld [smem:[#allocation18_spill]]  ;;  %s739_s29 = scalar_lea.vmem %s1148_s9, 1024 }
  0x6a   : > { %v303_v18 = vld [vmem:[%s1107_s10 + $0x18] sm:$0xff]  ;;  %v296_v23 = vld [vmem:[%s1115_s24 + $0x20] sm:$0xff]  ;;  %v297_v26 = vld [vmem:[%s1115_s24 + $0x28] sm:$0xff]  ;;  %s1257_s8 = sld [smem:[#allocation22_spill]]  ;;  %p740_p8 = scmp.ne.s32.totalorder %s1148_s9, %s739_s29 }
  0x6b   : > { %v311_v2 = vsub.s32 0, %v310_v1  ;;  %v315_v3 = vsub.s32 1, %v310_v1  ;;  %v319_v4 = vsub.s32 2, %v310_v1  ;;  %v323_v5 = vsub.s32 3, %v310_v1  ;;  %v304_v24 = vld [vmem:[%s1107_s10 + $0x20] sm:$0xff]  ;;  %v305_v27 = vld [vmem:[%s1107_s10 + $0x28] sm:$0xff] }
  0x6c   : > { %v306_v28 = vld [vmem:[%s1107_s10 + $0x30] sm:$0xff]  ;;  %v299_v34 = vld [vmem:[%s1115_s24 + $0x38] sm:$0xff]  ;;  %s874_s4 = smov [#allocation8]  }
  0x6d   : > { %s538_s19 = sshll.u32 %s1254_s6, 3  ;;  %v312_v9 = vrot.slane %v291_v6, %v311_v2  ;;  %v316_v12 = vrot.slane %v291_v6, %v315_v3  ;;  %v320_v14 = vrot.slane %v291_v6, %v319_v4  ;;  %v324_v15 = vrot.slane %v291_v6, %v323_v5  ;;  %v298_v33 = vld [vmem:[%s1115_s24 + $0x30] sm:$0xff]  ;;  %v307_v35 = vld [vmem:[%s1107_s10 + $0x38] sm:$0xff]  ;;  %s354_s10 = scalar_lea.sflag [#allocation4], %s1100_s25 }
  0x6e   : > { %s531_s20 = sshll.u32 %s1255_s23, 5  ;;  %s743_s24 = sshll.u32 %s874_s4, 4  ;;  %s744_s24 = int_to_ptr.vmem [resolvable:$false] %s743_s24 }
  0x6f   : > { %s1136_s28 = sadd.s32 %s538_s19, %s531_s20  ;;  %v329_v19 = vmul.f32 %v312_v9, %v300_v8  ;;  %v330_v20 = vmul.f32 %v316_v12, %v301_v11  ;;  %v331_v21 = vmul.f32 %v320_v14, %v302_v16  ;;  %v332_v22 = vmul.f32 %v324_v15, %v303_v18  ;;  %p1258_p9 = scmp.ne.s32.totalorder %s1256_s27, 0 }
  0x70   : > { %v333_v25 = vmul.f32 %v312_v9, %v304_v24  ;;  %s532_s12 = sshll.u32 %s1136_s28, 7  ;;  %v334_v37 = vmul.f32 %v316_v12, %v305_v27  ;;  %v335_v38 = vmul.f32 %v320_v14, %v306_v28  ;;  %v336_v39 = vmul.f32 %v324_v15, %v307_v35  ;;  %s745_s1 = scalar_lea.vmem %s744_s24, 2048 }
  0x71   : > { %v337_v29 = vadd.f32 %v329_v19, %v292_v7  ;;  %v338_v30 = vadd.f32 %v330_v20, %v293_v10  ;;  %v339_v31 = vadd.f32 %v331_v21, %v294_v13  ;;  %v340_v32 = vadd.f32 %v332_v22, %v295_v17  ;;  %s1153_s3 = scalar_lea.hbm %s1257_s8, %s532_s12  ;;  %p741_p4 = pnand %p740_p8, %p1258_p9 }
  0x72   : > { %v341_v36 = vadd.f32 %v333_v25, %v296_v23  ;;  %v342_v40 = vadd.f32 %v334_v37, %v297_v26  ;;  %v343_v41 = vadd.f32 %v335_v38, %v298_v33  ;;  %v344_v42 = vadd.f32 %v336_v39, %v299_v34  ;;  %p746_p1 = scmp.lt.s32.totalorder %s1148_s9, %s744_s24  ;;  %p747_p6 = scmp.lt.s32.totalorder %s745_s1, %s739_s29 }
  0x73   : > { %345 = vst [vmem:[%s287_s7] sm:$0xff] %v337_v29  ;;  %346 = vst [vmem:[%s287_s7 + $0x8] sm:$0xff] %v338_v30  ;;  %p742_p2 = pneg %p741_p4 }
  0x74   : > { %347 = vst [vmem:[%s287_s7 + $0x10] sm:$0xff] %v339_v31  ;;  %348 = vst [vmem:[%s287_s7 + $0x18] sm:$0xff] %v340_v32  ;;  %p748_p10 = por %p747_p6, %p746_p1 }
  0x75   : > { %349 = vst [vmem:[%s287_s7 + $0x20] sm:$0xff] %v341_v36  ;;  %350 = vst [vmem:[%s287_s7 + $0x28] sm:$0xff] %v342_v40 }
  0x76   : > { %351 = vst [vmem:[%s287_s7 + $0x30] sm:$0xff] %v343_v41  ;;  %352 = vst [vmem:[%s287_s7 + $0x38] sm:$0xff] %v344_v42  ;;  %p749_p13 = pnand %p748_p10, %p742_p2 }
  0x78   : > { %752 = shalt.err (!%p749_p13)
}
  0x79   : > { %s753_s30 = scalar_lea.hbm %s1153_s3, 1024  ;;  %s757_s23 = scalar_lea.hbm %s1257_s8, 8192 }
  0x7a   : > { %p754_p7 = scmp.ne.s32.totalorder %s1153_s3, %s753_s30  ;;  %p758_p5 = scmp.lt.s32.totalorder %s1153_s3, %s1257_s8 }
  0x7b   : > { %p759_p12 = scmp.lt.s32.totalorder %s757_s23, %s753_s30 }
  0x7c   : > { %p755_p3 = pnand %p754_p7, %p1258_p9 }
  0x7d   : > { %p760_p0 = por %p759_p12, %p758_p5 }
  0x7e   : > { %p756_p11 = pneg %p755_p3 }
  0x80   : > { %p761_p8 = pnand %p760_p0, %p756_p11 }
  0x82   : > { %764 = shalt.err (!%p761_p8)
}
  0x83   : > { %s875_s28 = smov 512   ;;  %s876_s7 = smov 32  }
  0x84   : > { %545 = dma.vmem_to_hbm [thread:$0]  (%p1258_p9), %s1148_s9, 1024, %s1153_s3, %s354_s10, %s875_s28, %s875_s28, %s876_s7  }
  0x85 PF: > { %s1259_s12 = sld [smem:[#allocation19_spill]]  ;;  %p562_p4 = scmp.ge.s32.totalorder %s867_s22, 2 }
  0x86   : > { %s385_s11 = sand.u32 1, %s839_s15  }
  0x87   : > { %s386_s26 = scalar_lea.sflag [#allocation4], %s385_s11 }
  0x8b   : > { %p1260_p2 = scmp.ne.s32.totalorder %s1259_s12, 0 }
  0x8d   : > { %p558_p1 = pnand %p562_p4, %p1260_p2 }
  0x8f   : > { %p559_p6 = pneg %p558_p1 }
  0x91   : > { %822 = dma.done.wait (%p559_p6), %s386_s26, 1024  }
  0x92   : > { %824 = vsyncadd (%p559_p6), %s386_s26, 4294966272  ;;  %s22_s22 = sadd.s32 1, %s867_s22   ;;  %s1261_s25 = sld [smem:[#allocation20_spill]] }
  0x93   : > { %p19_p10 = scmp.ge.s32.totalorder %s22_s22, 10   ;;  %s1262_s9 = sld [smem:[#allocation15_spill]] }
  0x94   : > { %s1263_s20 = sld [smem:[#allocation16_spill]]  ;;  %s1265_s12 = smov %s831_s13 }
  0x95   : > { %s1264_s27 = sld [smem:[#allocation17_spill]]  ;;  %s1266_s13 = smov %s835_s14 }
  0x96   : > { %s1267_s14 = smov %s1062_s18  ;;  %s1268_s15 = smov %s843_s16 }
  0x97   : > { %s1269_s16 = smov %s847_s17  ;;  %s1272_s19 = smov %s863_s21 }
  0x98   : > { %s1270_s17 = smov %s1261_s25  ;;  %21 = sbr.rel (!%p19_p10) target bundleno = 14 (0xe), region = 101 }
  0x99   : > { %s1271_s18 = smov %s1262_s9 }
  0x9b   : > { %s1273_s21 = smov %s1264_s27 }
  0x9d   :  { %391 = vsyncpa [#allocation3], 1 }
  0x9e   :  { %393 = vsyncpa [#allocation3 + $0x1], 1 }
  0x9f   :  { %394 = vsyncpa [#allocation6], 1 }
  0xa0   :  { %396 = vsyncpa [#allocation6 + $0x1], 1 }
  0xa1   :  { %397 = vsyncpa [#allocation4], 1 }
  0xa2   :  { %399 = vsyncpa [#allocation4 + $0x1], 1 }

</bundles_post_ra>
